<compile_context>
chip_gen: v5e
topology: v5e:2x2
jax: 0.10.0
libtpu: 0.0.40
codegen_flags: <defaults>
</compile_context>

<pallas_src>
import jax
import jax.numpy as jnp
from jax.experimental import pallas as pl
from jax.experimental.pallas import tpu as pltpu

LANE = 128


def _round_up(x, m):
    return ((x + m - 1) // m) * m


def _pad2(a, rows, cols, dtype):
    a = jnp.asarray(a, dtype)
    r, c = a.shape
    return jnp.pad(a, ((0, rows - r), (0, cols - c)))


# ---------------------------------------------------------------------------
# Fused kernel: StaticEncoder + Autoencoder (encoder -> latent -> decoder -> denorm)
# ---------------------------------------------------------------------------
def generator_kernel(motion_ref, offs_ref, mean_ref, std_ref,
                     se_w1_ref, se_b1_ref, se_w2_ref, se_b2_ref,
                     we1x_ref, we1s_ref, be1_ref, we2_ref, be2_ref,
                     wd1_ref, bd1_ref, wd2_ref, bd2_ref,
                     lat_ref, res_ref):
    cdt = we1x_ref.dtype  # MXU input dtype (bf16); accumulation is f32

    # ---- StaticEncoder: flatten(offsets) -> Linear -> ReLU -> Linear ----
    s = jnp.dot(offs_ref[...], se_w1_ref[...], preferred_element_type=jnp.float32)
    s = jnp.maximum(s + se_b1_ref[...], 0.0)
    s = jnp.dot(s.astype(cdt), se_w2_ref[...],
                preferred_element_type=jnp.float32) + se_b2_ref[...]

    # ---- Autoencoder encoder: concat(motion, static) as split matmul ----
    # static contribution is a per-feature constant -> fold into the bias once
    enc_bias = jnp.dot(s.astype(cdt), we1s_ref[...],
                       preferred_element_type=jnp.float32) + be1_ref[...]
    h = jnp.dot(motion_ref[...], we1x_ref[...], preferred_element_type=jnp.float32)
    h = jnp.maximum(h + enc_bias, 0.0)
    lat = jnp.dot(h.astype(cdt), we2_ref[...],
                  preferred_element_type=jnp.float32) + be2_ref[...]
    lat_ref[...] = lat.astype(lat_ref.dtype)

    # ---- Decoder ----
    hd = jnp.dot(lat.astype(cdt), wd1_ref[...],
                 preferred_element_type=jnp.float32) + bd1_ref[...]
    hd = jnp.maximum(hd, 0.0)
    y = jnp.dot(hd.astype(cdt), wd2_ref[...],
                preferred_element_type=jnp.float32) + bd2_ref[...]

    # ---- De-normalization with dataset dual-quaternion stats ----
    res_ref[...] = (y * std_ref[...] + mean_ref[...]).astype(res_ref.dtype)
    # TODO(synk): denorm_offsets (root-translation re-offsetting) has no defined
    # semantics in the reference skeleton; accepted by the wrapper, not applied.


# ---------------------------------------------------------------------------
# Wrapper == Generator_Model.forward()
# ---------------------------------------------------------------------------
def generator_forward(data, params, *, tile_rows=512, compute_dtype=jnp.bfloat16):
    B, T, D_s = data["sparse_motion"].shape
    J = data["offsets"].shape[0]
    H = params["se_w2"].shape[1]
    L = params["we2"].shape[1]
    D_out = params["wd2"].shape[1]

    # ---- pad feature dims to the 128-lane width ------------------------
    J3p = _round_up(J * 3, LANE)
    Dsp = _round_up(D_s, LANE)
    Hp = _round_up(H, LANE)
    Lp = _round_up(L, LANE)
    Dop = _round_up(D_out, LANE)

    # ---- row tiling: pad rows so any B*T works -------------------------
    N = B * T
    n8 = _round_up(N, 8)
    tile = min(_round_up(tile_rows, 8), n8)
    Np = _round_up(n8, tile)
    grid = (Np // tile,)

    motion_p = _pad2(data["sparse_motion"].reshape(N, D_s), Np, Dsp, compute_dtype)
    offs_p = _pad2(data["offsets"].reshape(1, J * 3), 1, J3p, compute_dtype)
    mean_p = _pad2(data["mean_dqs"].reshape(1, D_out), 1, Dop, jnp.float32)
    std_p = _pad2(data["std_dqs"].reshape(1, D_out), 1, Dop, jnp.float32)

    w = lambda name, r, c: _pad2(params[name], r, c, compute_dtype)
    b = lambda name, c: _pad2(params[name], 1, c, jnp.float32)

    weights = [
        w("se_w1", J3p, Hp), b("se_b1", Hp), w("se_w2", Hp, Hp), b("se_b2", Hp),
        w("we1x", Dsp, Hp), w("we1s", Hp, Hp), b("be1", Hp),
        w("we2", Hp, Lp), b("be2", Lp),
        w("wd1", Lp, Hp), b("bd1", Hp),
        w("wd2", Hp, Dop), b("bd2", Dop),
    ]

    row_spec = lambda d: pl.BlockSpec((tile, d), lambda i: (i, 0))
    res_spec = lambda a: pl.BlockSpec(a.shape, lambda i: (0, 0))  # resident

    in_specs = ([row_spec(Dsp), res_spec(offs_p), res_spec(mean_p), res_spec(std_p)]
                + [res_spec(a) for a in weights])

    flops = int(2 * Np * (Dsp * Hp + Hp * Lp + Lp * Hp + Hp * Dop)
                + 2 * grid[0] * (J3p * Hp + 2 * Hp * Hp))
    bytes_accessed = int(motion_p.size * motion_p.dtype.itemsize
                         + Np * (Lp + Dop) * 4
                         + sum(a.size * a.dtype.itemsize for a in weights))

    latent, res = pl.pallas_call(
        generator_kernel,
        grid_spec=pl.GridSpec(
            grid=grid,
            in_specs=in_specs,
            out_specs=[row_spec(Lp), row_spec(Dop)],
        ),
        out_shape=(
            jax.ShapeDtypeStruct((Np, Lp), jnp.float32),
            jax.ShapeDtypeStruct((Np, Dop), jnp.float32),
        ),
        compiler_params=pltpu.CompilerParams(
            dimension_semantics=("parallel",),
            vmem_limit_bytes=48 * 1024 * 1024,
        ),
        cost_estimate=pl.CostEstimate(
            flops=flops, transcendentals=0, bytes_accessed=bytes_accessed),
    )(motion_p, offs_p, mean_p, std_p, *weights)

    latent = latent[:N, :L].reshape(B, T, L)
    res = res[:N, :D_out].reshape(B, T, D_out)
    return latent, res


# ---------------------------------------------------------------------------
# Deterministic parameter construction
# ---------------------------------------------------------------------------
def make_params(key, J, D_s, H, L, D_out):
    ks = jax.random.split(key, 8)
    init = lambda k, shp, fan_in: (jax.random.normal(k, shp, jnp.float32)
                                   / jnp.sqrt(jnp.float32(fan_in)))
    return {
        # static encoder
        "se_w1": init(ks[0], (J * 3, H), J * 3),
        "se_b1": jnp.zeros((1, H), jnp.float32),
        "se_w2": init(ks[1], (H, H), H),
        "se_b2": jnp.zeros((1, H), jnp.float32),
        # autoencoder encoder (split weight for concat(motion, static))
        "we1x": init(ks[2], (D_s, H), D_s + H),
        "we1s": init(ks[3], (H, H), D_s + H),
        "be1": jnp.zeros((1, H), jnp.float32),
        "we2": init(ks[4], (H, L), H),
        "be2": jnp.zeros((1, L), jnp.float32),
        # autoencoder decoder
        "wd1": init(ks[5], (L, H), L),
        "bd1": jnp.zeros((1, H), jnp.float32),
        "wd2": init(ks[6], (H, D_out), H),
        "bd2": jnp.zeros((1, D_out), jnp.float32),
    }


if __name__ == "__main__":
    key = jax.random.PRNGKey(0)
    kd, kp = jax.random.split(key)

    # Small shapes implied by the forward pass:
    B, T = 2, 8          # batch, frames
    J = 4                # joints
    D_s = 24             # sparse dual-quaternion motion features per frame
    H, L = 32, 16        # hidden / latent widths
    D_out = J * 8        # full dual-quaternion output (8 per joint)

    kds = jax.random.split(kd, 5)
    data = {
        "offsets": jax.random.normal(kds[0], (J, 3), jnp.float32),
        "sparse_motion": jax.random.normal(kds[1], (B, T, D_s), jnp.float32),
        "mean_dqs": jax.random.normal(kds[2], (D_out,), jnp.float32) * 0.1,
        "std_dqs": jnp.abs(jax.random.normal(kds[3], (D_out,), jnp.float32)) + 0.5,
        "denorm_offsets": jax.random.normal(kds[4], (J, 3), jnp.float32),
    }
    params = make_params(kp, J, D_s, H, L, D_out)

    latent, res_decoder = generator_forward(data, params)
    jax.block_until_ready(res_decoder)

    assert latent.shape == (B, T, L)
    assert res_decoder.shape == (B, T, D_out)
    assert jnp.all(jnp.isfinite(latent))
    assert jnp.all(jnp.isfinite(res_decoder))
    print("KERNEL_OK")
</pallas_src>

<mosaic_0001>
module attributes {stable_mosaic.version = 11 : i64} {
  func.func @generator_kernel(%arg0: i32, %arg1: memref<16x128xbf16, #tpu.memory_space<vmem>>, %arg2: memref<1x128xbf16, #tpu.memory_space<vmem>>, %arg3: memref<1x128xf32, #tpu.memory_space<vmem>>, %arg4: memref<1x128xf32, #tpu.memory_space<vmem>>, %arg5: memref<128x128xbf16, #tpu.memory_space<vmem>>, %arg6: memref<1x128xf32, #tpu.memory_space<vmem>>, %arg7: memref<128x128xbf16, #tpu.memory_space<vmem>>, %arg8: memref<1x128xf32, #tpu.memory_space<vmem>>, %arg9: memref<128x128xbf16, #tpu.memory_space<vmem>>, %arg10: memref<128x128xbf16, #tpu.memory_space<vmem>>, %arg11: memref<1x128xf32, #tpu.memory_space<vmem>>, %arg12: memref<128x128xbf16, #tpu.memory_space<vmem>>, %arg13: memref<1x128xf32, #tpu.memory_space<vmem>>, %arg14: memref<128x128xbf16, #tpu.memory_space<vmem>>, %arg15: memref<1x128xf32, #tpu.memory_space<vmem>>, %arg16: memref<128x128xbf16, #tpu.memory_space<vmem>>, %arg17: memref<1x128xf32, #tpu.memory_space<vmem>>, %arg18: memref<16x128xf32, #tpu.memory_space<vmem>>, %arg19: memref<16x128xf32, #tpu.memory_space<vmem>>) attributes {dimension_semantics = [#tpu.dimension_semantics<parallel>], iteration_bounds = array<i64: 1>, scalar_prefetch = 0 : i64, scratch_operands = 0 : i64, tpu.core_type = #tpu.core_type<tc>, window_params = [{transform_indices = @transform_0, window_bounds = array<i64: 16, 128>}, {pipeline_mode = #tpu.pipeline_mode<synchronous>, transform_indices = @transform_1, window_bounds = array<i64: 1, 128>}, {pipeline_mode = #tpu.pipeline_mode<synchronous>, transform_indices = @transform_2, window_bounds = array<i64: 1, 128>}, {pipeline_mode = #tpu.pipeline_mode<synchronous>, transform_indices = @transform_3, window_bounds = array<i64: 1, 128>}, {pipeline_mode = #tpu.pipeline_mode<synchronous>, transform_indices = @transform_4, window_bounds = array<i64: 128, 128>}, {pipeline_mode = #tpu.pipeline_mode<synchronous>, transform_indices = @transform_5, window_bounds = array<i64: 1, 128>}, {pipeline_mode = #tpu.pipeline_mode<synchronous>, transform_indices = @transform_6, window_bounds = array<i64: 128, 128>}, {pipeline_mode = #tpu.pipeline_mode<synchronous>, transform_indices = @transform_7, window_bounds = array<i64: 1, 128>}, {pipeline_mode = #tpu.pipeline_mode<synchronous>, transform_indices = @transform_8, window_bounds = array<i64: 128, 128>}, {pipeline_mode = #tpu.pipeline_mode<synchronous>, transform_indices = @transform_9, window_bounds = array<i64: 128, 128>}, {pipeline_mode = #tpu.pipeline_mode<synchronous>, transform_indices = @transform_10, window_bounds = array<i64: 1, 128>}, {pipeline_mode = #tpu.pipeline_mode<synchronous>, transform_indices = @transform_11, window_bounds = array<i64: 128, 128>}, {pipeline_mode = #tpu.pipeline_mode<synchronous>, transform_indices = @transform_12, window_bounds = array<i64: 1, 128>}, {pipeline_mode = #tpu.pipeline_mode<synchronous>, transform_indices = @transform_13, window_bounds = array<i64: 128, 128>}, {pipeline_mode = #tpu.pipeline_mode<synchronous>, transform_indices = @transform_14, window_bounds = array<i64: 1, 128>}, {pipeline_mode = #tpu.pipeline_mode<synchronous>, transform_indices = @transform_15, window_bounds = array<i64: 128, 128>}, {pipeline_mode = #tpu.pipeline_mode<synchronous>, transform_indices = @transform_16, window_bounds = array<i64: 1, 128>}, {transform_indices = @transform_17, window_bounds = array<i64: 16, 128>}, {transform_indices = @transform_18, window_bounds = array<i64: 16, 128>}]} {
    %c0 = arith.constant 0 : index
    %c0_0 = arith.constant 0 : index
    %0 = vector.load %arg2[%c0, %c0_0] : memref<1x128xbf16, #tpu.memory_space<vmem>>, vector<1x128xbf16>
    %c0_1 = arith.constant 0 : index
    %c0_2 = arith.constant 0 : index
    %1 = vector.load %arg5[%c0_1, %c0_2] : memref<128x128xbf16, #tpu.memory_space<vmem>>, vector<128x128xbf16>
    %cst = arith.constant dense<0.000000e+00> : vector<1x128xf32>
    %2 = tpu.matmul %0, %1, %cst {dimension_numbers = #tpu.dot_dimension_numbers<[1], [0], [0], [1], [0, 0, 1, 1], [], []>} : vector<1x128xbf16>, vector<128x128xbf16>, vector<1x128xf32> -> vector<1x128xf32>
    %c0_3 = arith.constant 0 : index
    %c0_4 = arith.constant 0 : index
    %3 = vector.load %arg6[%c0_3, %c0_4] : memref<1x128xf32, #tpu.memory_space<vmem>>, vector<1x128xf32>
    %4 = arith.addf %2, %3 : vector<1x128xf32>
    %cst_5 = arith.constant 0.000000e+00 : f32
    %5 = vector.broadcast %cst_5 : f32 to vector<1x128xf32>
    %6 = arith.maximumf %4, %5 : vector<1x128xf32>
    %7 = arith.truncf %6 : vector<1x128xf32> to vector<1x128xbf16>
    %c0_6 = arith.constant 0 : index
    %c0_7 = arith.constant 0 : index
    %8 = vector.load %arg7[%c0_6, %c0_7] : memref<128x128xbf16, #tpu.memory_space<vmem>>, vector<128x128xbf16>
    %cst_8 = arith.constant dense<0.000000e+00> : vector<1x128xf32>
    %9 = tpu.matmul %7, %8, %cst_8 {dimension_numbers = #tpu.dot_dimension_numbers<[1], [0], [0], [1], [0, 0, 1, 1], [], []>} : vector<1x128xbf16>, vector<128x128xbf16>, vector<1x128xf32> -> vector<1x128xf32>
    %c0_9 = arith.constant 0 : index
    %c0_10 = arith.constant 0 : index
    %10 = vector.load %arg8[%c0_9, %c0_10] : memref<1x128xf32, #tpu.memory_space<vmem>>, vector<1x128xf32>
    %11 = arith.addf %9, %10 : vector<1x128xf32>
    %12 = arith.truncf %11 : vector<1x128xf32> to vector<1x128xbf16>
    %c0_11 = arith.constant 0 : index
    %c0_12 = arith.constant 0 : index
    %13 = vector.load %arg10[%c0_11, %c0_12] : memref<128x128xbf16, #tpu.memory_space<vmem>>, vector<128x128xbf16>
    %cst_13 = arith.constant dense<0.000000e+00> : vector<1x128xf32>
    %14 = tpu.matmul %12, %13, %cst_13 {dimension_numbers = #tpu.dot_dimension_numbers<[1], [0], [0], [1], [0, 0, 1, 1], [], []>} : vector<1x128xbf16>, vector<128x128xbf16>, vector<1x128xf32> -> vector<1x128xf32>
    %c0_14 = arith.constant 0 : index
    %c0_15 = arith.constant 0 : index
    %15 = vector.load %arg11[%c0_14, %c0_15] : memref<1x128xf32, #tpu.memory_space<vmem>>, vector<1x128xf32>
    %16 = arith.addf %14, %15 : vector<1x128xf32>
    %c0_16 = arith.constant 0 : index
    %c0_17 = arith.constant 0 : index
    %17 = vector.load %arg1[%c0_16, %c0_17] : memref<16x128xbf16, #tpu.memory_space<vmem>>, vector<16x128xbf16>
    %c0_18 = arith.constant 0 : index
    %c0_19 = arith.constant 0 : index
    %18 = vector.load %arg9[%c0_18, %c0_19] : memref<128x128xbf16, #tpu.memory_space<vmem>>, vector<128x128xbf16>
    %cst_20 = arith.constant dense<0.000000e+00> : vector<16x128xf32>
    %19 = tpu.matmul %17, %18, %cst_20 {dimension_numbers = #tpu.dot_dimension_numbers<[1], [0], [0], [1], [0, 0, 1, 1], [], []>} : vector<16x128xbf16>, vector<128x128xbf16>, vector<16x128xf32> -> vector<16x128xf32>
    %20 = vector.broadcast %16 : vector<1x128xf32> to vector<16x128xf32>
    %21 = arith.addf %19, %20 : vector<16x128xf32>
    %cst_21 = arith.constant 0.000000e+00 : f32
    %22 = vector.broadcast %cst_21 : f32 to vector<16x128xf32>
    %23 = arith.maximumf %21, %22 : vector<16x128xf32>
    %24 = arith.truncf %23 : vector<16x128xf32> to vector<16x128xbf16>
    %c0_22 = arith.constant 0 : index
    %c0_23 = arith.constant 0 : index
    %25 = vector.load %arg12[%c0_22, %c0_23] : memref<128x128xbf16, #tpu.memory_space<vmem>>, vector<128x128xbf16>
    %cst_24 = arith.constant dense<0.000000e+00> : vector<16x128xf32>
    %26 = tpu.matmul %24, %25, %cst_24 {dimension_numbers = #tpu.dot_dimension_numbers<[1], [0], [0], [1], [0, 0, 1, 1], [], []>} : vector<16x128xbf16>, vector<128x128xbf16>, vector<16x128xf32> -> vector<16x128xf32>
    %c0_25 = arith.constant 0 : index
    %c0_26 = arith.constant 0 : index
    %27 = vector.load %arg13[%c0_25, %c0_26] : memref<1x128xf32, #tpu.memory_space<vmem>>, vector<1x128xf32>
    %28 = vector.broadcast %27 : vector<1x128xf32> to vector<16x128xf32>
    %29 = arith.addf %26, %28 : vector<16x128xf32>
    %c0_27 = arith.constant 0 : index
    %c0_28 = arith.constant 0 : index
    %30 = vector.load %arg18[%c0_27, %c0_28] : memref<16x128xf32, #tpu.memory_space<vmem>>, vector<16x128xf32>
    tpu.vector_store %arg18[%c0_27, %c0_28], %29 {strides = array<i32>} : memref<16x128xf32, #tpu.memory_space<vmem>>, vector<16x128xf32>,
    %31 = arith.truncf %29 : vector<16x128xf32> to vector<16x128xbf16>
    %c0_29 = arith.constant 0 : index
    %c0_30 = arith.constant 0 : index
    %32 = vector.load %arg14[%c0_29, %c0_30] : memref<128x128xbf16, #tpu.memory_space<vmem>>, vector<128x128xbf16>
    %cst_31 = arith.constant dense<0.000000e+00> : vector<16x128xf32>
    %33 = tpu.matmul %31, %32, %cst_31 {dimension_numbers = #tpu.dot_dimension_numbers<[1], [0], [0], [1], [0, 0, 1, 1], [], []>} : vector<16x128xbf16>, vector<128x128xbf16>, vector<16x128xf32> -> vector<16x128xf32>
    %c0_32 = arith.constant 0 : index
    %c0_33 = arith.constant 0 : index
    %34 = vector.load %arg15[%c0_32, %c0_33] : memref<1x128xf32, #tpu.memory_space<vmem>>, vector<1x128xf32>
    %35 = vector.broadcast %34 : vector<1x128xf32> to vector<16x128xf32>
    %36 = arith.addf %33, %35 : vector<16x128xf32>
    %cst_34 = arith.constant 0.000000e+00 : f32
    %37 = vector.broadcast %cst_34 : f32 to vector<16x128xf32>
    %38 = arith.maximumf %36, %37 : vector<16x128xf32>
    %39 = arith.truncf %38 : vector<16x128xf32> to vector<16x128xbf16>
    %c0_35 = arith.constant 0 : index
    %c0_36 = arith.constant 0 : index
    %40 = vector.load %arg16[%c0_35, %c0_36] : memref<128x128xbf16, #tpu.memory_space<vmem>>, vector<128x128xbf16>
    %cst_37 = arith.constant dense<0.000000e+00> : vector<16x128xf32>
    %41 = tpu.matmul %39, %40, %cst_37 {dimension_numbers = #tpu.dot_dimension_numbers<[1], [0], [0], [1], [0, 0, 1, 1], [], []>} : vector<16x128xbf16>, vector<128x128xbf16>, vector<16x128xf32> -> vector<16x128xf32>
    %c0_38 = arith.constant 0 : index
    %c0_39 = arith.constant 0 : index
    %42 = vector.load %arg17[%c0_38, %c0_39] : memref<1x128xf32, #tpu.memory_space<vmem>>, vector<1x128xf32>
    %43 = vector.broadcast %42 : vector<1x128xf32> to vector<16x128xf32>
    %44 = arith.addf %41, %43 : vector<16x128xf32>
    %c0_40 = arith.constant 0 : index
    %c0_41 = arith.constant 0 : index
    %45 = vector.load %arg4[%c0_40, %c0_41] : memref<1x128xf32, #tpu.memory_space<vmem>>, vector<1x128xf32>
    %46 = vector.broadcast %45 : vector<1x128xf32> to vector<16x128xf32>
    %47 = arith.mulf %44, %46 : vector<16x128xf32>
    %c0_42 = arith.constant 0 : index
    %c0_43 = arith.constant 0 : index
    %48 = vector.load %arg3[%c0_42, %c0_43] : memref<1x128xf32, #tpu.memory_space<vmem>>, vector<1x128xf32>
    %49 = vector.broadcast %48 : vector<1x128xf32> to vector<16x128xf32>
    %50 = arith.addf %47, %49 : vector<16x128xf32>
    %c0_44 = arith.constant 0 : index
    %c0_45 = arith.constant 0 : index
    %51 = vector.load %arg19[%c0_44, %c0_45] : memref<16x128xf32, #tpu.memory_space<vmem>>, vector<16x128xf32>
    tpu.vector_store %arg19[%c0_44, %c0_45], %50 {strides = array<i32>} : memref<16x128xf32, #tpu.memory_space<vmem>>, vector<16x128xf32>,
    return
  }
  func.func @transform_0(%arg0: i32) -> (i32, i32) {
    %c0_i32 = arith.constant 0 : i32
    %c0_i32_0 = arith.constant 0 : i32
    return %arg0, %c0_i32 : i32, i32
  }
  func.func @transform_1(%arg0: i32) -> (i32, i32) {
    %c0_i32 = arith.constant 0 : i32
    %c0_i32_0 = arith.constant 0 : i32
    %c0_i32_1 = arith.constant 0 : i32
    return %c0_i32, %c0_i32_0 : i32, i32
  }
  func.func @transform_2(%arg0: i32) -> (i32, i32) {
    %c0_i32 = arith.constant 0 : i32
    %c0_i32_0 = arith.constant 0 : i32
    %c0_i32_1 = arith.constant 0 : i32
    return %c0_i32, %c0_i32_0 : i32, i32
  }
  func.func @transform_3(%arg0: i32) -> (i32, i32) {
    %c0_i32 = arith.constant 0 : i32
    %c0_i32_0 = arith.constant 0 : i32
    %c0_i32_1 = arith.constant 0 : i32
    return %c0_i32, %c0_i32_0 : i32, i32
  }
  func.func @transform_4(%arg0: i32) -> (i32, i32) {
    %c0_i32 = arith.constant 0 : i32
    %c0_i32_0 = arith.constant 0 : i32
    %c0_i32_1 = arith.constant 0 : i32
    return %c0_i32, %c0_i32_0 : i32, i32
  }
  func.func @transform_5(%arg0: i32) -> (i32, i32) {
    %c0_i32 = arith.constant 0 : i32
    %c0_i32_0 = arith.constant 0 : i32
    %c0_i32_1 = arith.constant 0 : i32
    return %c0_i32, %c0_i32_0 : i32, i32
  }
  func.func @transform_6(%arg0: i32) -> (i32, i32) {
    %c0_i32 = arith.constant 0 : i32
    %c0_i32_0 = arith.constant 0 : i32
    %c0_i32_1 = arith.constant 0 : i32
    return %c0_i32, %c0_i32_0 : i32, i32
  }
  func.func @transform_7(%arg0: i32) -> (i32, i32) {
    %c0_i32 = arith.constant 0 : i32
    %c0_i32_0 = arith.constant 0 : i32
    %c0_i32_1 = arith.constant 0 : i32
    return %c0_i32, %c0_i32_0 : i32, i32
  }
  func.func @transform_8(%arg0: i32) -> (i32, i32) {
    %c0_i32 = arith.constant 0 : i32
    %c0_i32_0 = arith.constant 0 : i32
    %c0_i32_1 = arith.constant 0 : i32
    return %c0_i32, %c0_i32_0 : i32, i32
  }
  func.func @transform_9(%arg0: i32) -> (i32, i32) {
    %c0_i32 = arith.constant 0 : i32
    %c0_i32_0 = arith.constant 0 : i32
    %c0_i32_1 = arith.constant 0 : i32
    return %c0_i32, %c0_i32_0 : i32, i32
  }
  func.func @transform_10(%arg0: i32) -> (i32, i32) {
    %c0_i32 = arith.constant 0 : i32
    %c0_i32_0 = arith.constant 0 : i32
    %c0_i32_1 = arith.constant 0 : i32
    return %c0_i32, %c0_i32_0 : i32, i32
  }
  func.func @transform_11(%arg0: i32) -> (i32, i32) {
    %c0_i32 = arith.constant 0 : i32
    %c0_i32_0 = arith.constant 0 : i32
    %c0_i32_1 = arith.constant 0 : i32
    return %c0_i32, %c0_i32_0 : i32, i32
  }
  func.func @transform_12(%arg0: i32) -> (i32, i32) {
    %c0_i32 = arith.constant 0 : i32
    %c0_i32_0 = arith.constant 0 : i32
    %c0_i32_1 = arith.constant 0 : i32
    return %c0_i32, %c0_i32_0 : i32, i32
  }
  func.func @transform_13(%arg0: i32) -> (i32, i32) {
    %c0_i32 = arith.constant 0 : i32
    %c0_i32_0 = arith.constant 0 : i32
    %c0_i32_1 = arith.constant 0 : i32
    return %c0_i32, %c0_i32_0 : i32, i32
  }
  func.func @transform_14(%arg0: i32) -> (i32, i32) {
    %c0_i32 = arith.constant 0 : i32
    %c0_i32_0 = arith.constant 0 : i32
    %c0_i32_1 = arith.constant 0 : i32
    return %c0_i32, %c0_i32_0 : i32, i32
  }
  func.func @transform_15(%arg0: i32) -> (i32, i32) {
    %c0_i32 = arith.constant 0 : i32
    %c0_i32_0 = arith.constant 0 : i32
    %c0_i32_1 = arith.constant 0 : i32
    return %c0_i32, %c0_i32_0 : i32, i32
  }
  func.func @transform_16(%arg0: i32) -> (i32, i32) {
    %c0_i32 = arith.constant 0 : i32
    %c0_i32_0 = arith.constant 0 : i32
    %c0_i32_1 = arith.constant 0 : i32
    return %c0_i32, %c0_i32_0 : i32, i32
  }
  func.func @transform_17(%arg0: i32) -> (i32, i32) {
    %c0_i32 = arith.constant 0 : i32
    %c0_i32_0 = arith.constant 0 : i32
    return %arg0, %c0_i32 : i32, i32
  }
  func.func @transform_18(%arg0: i32) -> (i32, i32) {
    %c0_i32 = arith.constant 0 : i32
    %c0_i32_0 = arith.constant 0 : i32
    return %arg0, %c0_i32 : i32, i32
  }
}

</mosaic_0001>

<bundles_post_ra>
// kernel: tpu_custom_call.1
= control target key start
LH: loop header
LB: loop body
LE: loop exit
PB: predicated region body
PF: predicated region fallthrough
CT: control target
= control target key end

     0   :  { %s1607_s0 = inlined_call_operand.hbm [shape: bf16[16,128], index: 0, kind: input, shape index: {}]   ;;  %s1608_s1 = inlined_call_operand.hbm [shape: bf16[1,128], index: 1, kind: input, shape index: {}]   ;;  %s1609_s2 = inlined_call_operand.vmem [shape: f32[1,128], index: 2, kind: input, shape index: {}]   ;;  %s1610_s3 = inlined_call_operand.vmem [shape: f32[1,128], index: 3, kind: input, shape index: {}]   ;;  %s1611_s4 = inlined_call_operand.hbm [shape: bf16[128,128], index: 4, kind: input, shape index: {}]   ;;  %s1612_s5 = inlined_call_operand.vmem [shape: f32[1,128], index: 5, kind: input, shape index: {}]   ;;  %s1613_s6 = inlined_call_operand.hbm [shape: bf16[128,128], index: 6, kind: input, shape index: {}]   ;;  %s1614_s7 = inlined_call_operand.vmem [shape: f32[1,128], index: 7, kind: input, shape index: {}]   ;;  %s1615_s8 = inlined_call_operand.hbm [shape: bf16[128,128], index: 8, kind: input, shape index: {}]   ;;  %s1616_s9 = inlined_call_operand.hbm [shape: bf16[128,128], index: 9, kind: input, shape index: {}]   ;;  %s1617_s10 = inlined_call_operand.vmem [shape: f32[1,128], index: 10, kind: input, shape index: {}]   ;;  %s1618_s11 = inlined_call_operand.hbm [shape: bf16[128,128], index: 11, kind: input, shape index: {}]   ;;  %s1619_s12 = inlined_call_operand.vmem [shape: f32[1,128], index: 12, kind: input, shape index: {}]   ;;  %s1620_s13 = inlined_call_operand.hbm [shape: bf16[128,128], index: 13, kind: input, shape index: {}]   ;;  %s1621_s14 = inlined_call_operand.vmem [shape: f32[1,128], index: 14, kind: input, shape index: {}]   ;;  %s1622_s15 = inlined_call_operand.hbm [shape: bf16[128,128], index: 15, kind: input, shape index: {}]   ;;  %s1623_s16 = inlined_call_operand.vmem [shape: f32[1,128], index: 16, kind: input, shape index: {}]   ;;  %s1624_s17 = inlined_call_operand.hbm [shape: f32[16,128], index: 17, kind: output, shape index: {0}]   ;;  %s1625_s18 = inlined_call_operand.hbm [shape: f32[16,128], index: 18, kind: output, shape index: {1}]  }
   0x1   :  { %1626 = sst [smem:[#allocation27_spill]] %s1607_s0 }
   0x2   :  { %1627 = sst [smem:[#allocation28_spill]] %s1608_s1 }
   0x3   :  { %1628 = sst [smem:[#allocation29_spill]] %s1609_s2 }
   0x4   :  { %24 = vsyncpa [#allocation3], 0 }
   0x5   :  { %25 = vsyncpa [#allocation6], 0 }
   0x6   :  { %26 = vsyncpa [#allocation9], 0 }
   0x7   :  { %27 = vsyncpa [#allocation12], 0 }
   0x8   :  { %28 = vsyncpa [#allocation15], 0 }
   0x9   :  { %29 = vsyncpa [#allocation4], 0  ;;  %s1629_s29 = sld [smem:[#allocation28_spill]] }
   0xf   :  { %s49_s30 = sshll.u32 %s1629_s29, 4  ;;  %s50_s30 = int_to_ptr.hbm [resolvable:$true] %s49_s30 }
  0x10   :  { %30 = vsyncpa [#allocation19], 0  ;;  %s1416_s0 = smov [#allocation5]   ;;  %s78_s21 = sshll.u32 %s1613_s6, 4  ;;  %s79_s21 = int_to_ptr.hbm [resolvable:$true] %s78_s21 }
  0x11   :  { %s51_s19 = sshll.u32 %s1416_s0, 4  ;;  %s1417_s22 = smov [#allocation8]   ;;  %s52_s19 = int_to_ptr.vmem [resolvable:$true] %s51_s19 }
  0x12   :  { %54 = dma.hbm_to_vmem [thread:$0]  %s50_s30, 16, %s52_s19, [#allocation6]  }
  0x13   :  { %s80_s2 = sshll.u32 %s1417_s22, 4  ;;  %s106_s25 = sshll.u32 %s1616_s9, 4  ;;  %s81_s2 = int_to_ptr.vmem [resolvable:$true] %s80_s2  ;;  %s107_s25 = int_to_ptr.hbm [resolvable:$true] %s106_s25 }
  0x14   :  { %s1418_s26 = smov 64   ;;  %s1419_s27 = smov 4  }
  0x15   :  { %86 = dma.hbm_to_vmem [thread:$0]  %s79_s21, 1024, %s81_s2, [#allocation9], %s1418_s26, %s1418_s26, %s1419_s27  }
  0x16   :  { %s136_s30 = sshll.u32 %s1620_s13, 4  ;;  %s1420_s6 = smov [#allocation11]   ;;  %s137_s30 = int_to_ptr.hbm [resolvable:$true] %s136_s30 }
  0x17   :  { %s108_s0 = sshll.u32 %s1420_s6, 4  ;;  %s1421_s9 = smov [#allocation14]   ;;  %s109_s0 = int_to_ptr.vmem [resolvable:$true] %s108_s0 }
  0x18   :  { %114 = dma.hbm_to_vmem [thread:$0]  %s107_s25, 1024, %s109_s0, [#allocation12], %s1418_s26, %s1418_s26, %s1419_s27  }
  0x19   :  { %s138_s19 = sshll.u32 %s1421_s9, 4  ;;  %s1630_s22 = sld [smem:[#allocation27_spill]]  ;;  %s139_s19 = int_to_ptr.vmem [resolvable:$true] %s138_s19 }
  0x1a   :  { %144 = dma.hbm_to_vmem [thread:$0]  %s137_s30, 1024, %s139_s19, [#allocation15], %s1418_s26, %s1418_s26, %s1419_s27  }
  0x1b   :  { %s63_s2 = sshll.u32 %s1611_s4, 4  ;;  %s1422_s24 = smov [#allocation2]   ;;  %s64_s2 = int_to_ptr.hbm [resolvable:$true] %s63_s2 }
  0x1c   :  { %s37_s28 = sshll.u32 %s1422_s24, 4  ;;  %s1423_s25 = smov [#allocation7]   ;;  %s38_s28 = int_to_ptr.vmem [resolvable:$true] %s37_s28 }
  0x1d   :  { %s65_s29 = sshll.u32 %s1423_s25, 4  ;;  %s93_s9 = sshll.u32 %s1615_s8, 4  ;;  %s66_s29 = int_to_ptr.vmem [resolvable:$true] %s65_s29  ;;  %s94_s9 = int_to_ptr.hbm [resolvable:$true] %s93_s9 }
  0x1e   :  { %71 = dma.hbm_to_vmem [thread:$0]  %s64_s2, 1024, %s66_s29, [#allocation6], %s1418_s26, %s1418_s26, %s1419_s27  }
  0x1f   :  { %s35_s23 = sshll.u32 %s1630_s22, 4  ;;  %s121_s19 = sshll.u32 %s1618_s11, 4  ;;  %s36_s23 = int_to_ptr.hbm [resolvable:$true] %s35_s23  ;;  %s122_s19 = int_to_ptr.hbm [resolvable:$true] %s121_s19 }
  0x20   :  { %43 = dma.hbm_to_vmem [thread:$0]  %s36_s23, 128, %s38_s28, [#allocation3], %s1418_s26, %s1418_s26, %s1419_s27  }
  0x21   :  { %s1424_s1 = smov [#allocation10]   ;;  %s1425_s22 = smov [#allocation13]  }
  0x22   :  { %s95_s20 = sshll.u32 %s1424_s1, 4  ;;  %s123_s8 = sshll.u32 %s1425_s22, 4  ;;  %s96_s20 = int_to_ptr.vmem [resolvable:$true] %s95_s20  ;;  %s124_s8 = int_to_ptr.vmem [resolvable:$true] %s123_s8 }
  0x23   :  { %101 = dma.hbm_to_vmem [thread:$0]  %s94_s9, 1024, %s96_s20, [#allocation9], %s1418_s26, %s1418_s26, %s1419_s27  }
  0x24   :  { %s151_s21 = sshll.u32 %s1622_s15, 4  ;;  %s1426_s11 = smov [#allocation16]   ;;  %s152_s21 = int_to_ptr.hbm [resolvable:$true] %s151_s21 }
  0x25   :  { %129 = dma.hbm_to_vmem [thread:$0]  %s122_s19, 1024, %s124_s8, [#allocation12], %s1418_s26, %s1418_s26, %s1419_s27  }
  0x26   :  { %s153_s2 = sshll.u32 %s1426_s11, 4  ;;  %s154_s2 = int_to_ptr.vmem [resolvable:$true] %s153_s2 }
  0x27   :  { %159 = dma.hbm_to_vmem [thread:$0]  %s152_s21, 1024, %s154_s2, [#allocation15], %s1418_s26, %s1418_s26, %s1419_s27  }
  0x28   :  { %1402 = dma.done.wait [#allocation3], 128  }
  0x29   :  { %1403 = vsyncadd [#allocation3], 4294967168 }
  0x2a   :  { %1404 = dma.done.wait [#allocation6], 1040  }
  0x2b   :  { %1405 = vsyncadd [#allocation6], 4294966256 }
  0x2c   :  { %1406 = dma.done.wait [#allocation9], 2048  }
  0x2d   :  { %1407 = vsyncadd [#allocation9], 4294965248 }
  0x2e   :  { %1408 = dma.done.wait [#allocation12], 2048  }
  0x2f   :  { %1409 = vsyncadd [#allocation12], 4294965248 }
  0x30   :  { %1410 = dma.done.wait [#allocation15], 2048  }
  0x31   :  { %1411 = vsyncadd [#allocation15], 4294965248  ;;  %v1068_v0 = vld [vmem:[#allocation7 + $0x38] sm:$0xff]  ;;  %v1067_v1 = vld [vmem:[#allocation7 + $0x30] sm:$0xff]  ;;  %s798_s4 = sshll.u32 %s1624_s17, 4  ;;  %s1428_s30 = smov 128   ;;  %s799_s4 = int_to_ptr.hbm [resolvable:$true] %s798_s4 }
  0x32   :  { %264 = vmatpush.bf16.msra.mxu0 %v1068_v0  ;;  %v1076_v2 = vld [vmem:[#allocation8 + $0x38] sm:$0xff]  ;;  %v1066_v3 = vld [vmem:[#allocation7 + $0x28] sm:$0xff]  ;;  %v1075_v4 = vld [vmem:[#allocation8 + $0x30] sm:$0xff]  ;;  %s1429_s19 = smov 8   ;;  %s1631_s13 = sld [smem:[#allocation29_spill]] }
  0x33   :  { %344 = vmatpush.bf16.msra.mxu1 %v1076_v2  ;;  %v1074_v5 = vld [vmem:[#allocation8 + $0x28] sm:$0xff]  ;;  %v1065_v6 = vld [vmem:[#allocation7 + $0x20] sm:$0xff]  ;;  %v1064_v8 = vld [vmem:[#allocation7 + $0x18] sm:$0xff]  ;;  %s1430_s17 = smov [#allocation18]  }
  0x34   :  { %v1073_v7 = vld [vmem:[#allocation8 + $0x20] sm:$0xff]  ;;  %v1072_v9 = vld [vmem:[#allocation8 + $0x18] sm:$0xff]  ;;  %v1063_v10 = vld [vmem:[#allocation7 + $0x10] sm:$0xff]  ;;  %s809_s21 = sshll.u32 %s1430_s17, 4  ;;  %s810_s21 = int_to_ptr.vmem [resolvable:$true] %s809_s21 }
  0x35   :  { %v1071_v11 = vld [vmem:[#allocation8 + $0x10] sm:$0xff]  ;;  %v1062_v12 = vld [vmem:[#allocation7 + $0x8] sm:$0xff]  ;;  %v1061_v13 = vld [vmem:[#allocation7] sm:$0xff] }
  0x36   :  { %265 = vmatpush.bf16.msra.mxu0 %v1067_v1  ;;  %v198_v14 = vld [vmem:[#allocation5] sm:$0x1]  ;;  %v1070_v15 = vld [vmem:[#allocation8 + $0x8] sm:$0xff]  ;;  %v1069_v16 = vld [vmem:[#allocation8] sm:$0xff] }
  0x37   :  { %345 = vmatpush.bf16.msra.mxu1 %v1075_v4  ;;  %v1093_v17 = vld [vmem:[#allocation10 + $0x38] sm:$0xff]  ;;  %v1092_v19 = vld [vmem:[#allocation10 + $0x30] sm:$0xff]  ;;  %v1091_v21 = vld [vmem:[#allocation10 + $0x28] sm:$0xff] }
  0x38   :  { %v1084_v18 = vld [vmem:[#allocation11 + $0x38] sm:$0xff]  ;;  %509 = vmatpush.bf16.msra.mxu3 %v1093_v17  ;;  %v1083_v20 = vld [vmem:[#allocation11 + $0x30] sm:$0xff]  ;;  %v1082_v22 = vld [vmem:[#allocation11 + $0x28] sm:$0xff] }
  0x39   :  { %423 = vmatpush.bf16.msra.mxu2 %v1084_v18  ;;  %v1090_v23 = vld [vmem:[#allocation10 + $0x20] sm:$0xff]  ;;  %v1089_v25 = vld [vmem:[#allocation10 + $0x18] sm:$0xff]  ;;  %v1088_v27 = vld [vmem:[#allocation10 + $0x10] sm:$0xff] }
  0x3a   :  { %266 = vmatpush.bf16.msra.mxu0 %v1066_v3  ;;  %v1081_v24 = vld [vmem:[#allocation11 + $0x20] sm:$0xff]  ;;  %v1080_v26 = vld [vmem:[#allocation11 + $0x18] sm:$0xff]  ;;  %v1079_v28 = vld [vmem:[#allocation11 + $0x10] sm:$0xff] }
  0x3b   :  { %346 = vmatpush.bf16.msra.mxu1 %v1074_v5  ;;  %v215_v29 = vld [vmem:[%s1612_s5] sm:$0x1]  ;;  %v1087_v30 = vld [vmem:[#allocation10 + $0x8] sm:$0xff]  ;;  %v1086_v34 = vld [vmem:[#allocation10] sm:$0xff] }
  0x3c   :  { %510 = vmatpush.bf16.msra.mxu3 %v1092_v19  ;;  %v1078_v31 = vld [vmem:[#allocation11 + $0x8] sm:$0xff]  ;;  %v1085_v37 = vld [vmem:[#allocation2] sm:$0xff]  ;;  %v1077_v39 = vld [vmem:[#allocation11] sm:$0xff] }
  0x3d   :  { %424 = vmatpush.bf16.msra.mxu2 %v1083_v20  ;;  %v1101_v40 = vld [vmem:[#allocation13 + $0x38] sm:$0xff]  ;;  %v1100_v41 = vld [vmem:[#allocation13 + $0x30] sm:$0xff]  ;;  %v1099_v42 = vld [vmem:[#allocation13 + $0x28] sm:$0xff] }
  0x3e   :  { %267 = vmatpush.bf16.msra.mxu0 %v1065_v6  ;;  %v1098_v43 = vld [vmem:[#allocation13 + $0x20] sm:$0xff]  ;;  %v1097_v44 = vld [vmem:[#allocation13 + $0x18] sm:$0xff]  ;;  %v295_v45 = vld [vmem:[%s1614_s7] sm:$0x1] }
  0x3f   :  { %347 = vmatpush.bf16.msra.mxu1 %v1073_v7  ;;  %v1096_v50 = vld [vmem:[#allocation13 + $0x10] sm:$0xff]  ;;  %v1095_v51 = vld [vmem:[#allocation13 + $0x8] sm:$0xff]  ;;  %v1094_v52 = vld [vmem:[#allocation13] sm:$0xff] }
  0x40   :  { %511 = vmatpush.bf16.msra.mxu3 %v1091_v21  ;;  %v1109_v53 = vld [vmem:[#allocation14 + $0x38] sm:$0xff]  ;;  %v1108_v54 = vld [vmem:[#allocation14 + $0x30] sm:$0xff]  ;;  %v1107_v55 = vld [vmem:[#allocation14 + $0x28] sm:$0xff] }
  0x41   :  { %425 = vmatpush.bf16.msra.mxu2 %v1082_v22  ;;  %v1106_v56 = vld [vmem:[#allocation14 + $0x20] sm:$0xff]  ;;  %v1105_v57 = vld [vmem:[#allocation14 + $0x18] sm:$0xff]  ;;  %v374_v59 = vld [vmem:[%s1617_s10] sm:$0x1] }
  0x42   :  { %268 = vmatpush.bf16.msra.mxu0 %v1064_v8  ;;  %v1104_v6 = vld [vmem:[#allocation14 + $0x10] sm:$0xff]  ;;  %v1103_v7 = vld [vmem:[#allocation14 + $0x8] sm:$0xff]  ;;  %v1102_v8 = vld [vmem:[#allocation14] sm:$0xff] }
  0x43   :  { %348 = vmatpush.bf16.msra.mxu1 %v1072_v9  ;;  %v1117_v9 = vld [vmem:[#allocation16 + $0x38] sm:$0xff]  ;;  %v1112_v20 = vld [vmem:[#allocation16 + $0x10] sm:$0xff]  ;;  %v1111_v21 = vld [vmem:[#allocation16 + $0x8] sm:$0xff] }
  0x44   :  { %512 = vmatpush.bf16.msra.mxu3 %v1090_v23  ;;  %v1113_v19 = vld [vmem:[#allocation16 + $0x18] sm:$0xff]  ;;  %v1110_v22 = vld [vmem:[#allocation16] sm:$0xff] }
  0x45   :  { %426 = vmatpush.bf16.msra.mxu2 %v1081_v24  ;;  %v1134_v24 = vld [vmem:[%s1621_s14] ss:$0 sm:$0xff] }
  0x46   :  { %269 = vmatpush.bf16.msra.mxu0 %v1063_v10  ;;  %v1116_v10 = vld [vmem:[#allocation16 + $0x30] sm:$0xff] }
  0x47   :  { %349 = vmatpush.bf16.msra.mxu1 %v1071_v11  ;;  %v1115_v11 = vld [vmem:[#allocation16 + $0x28] sm:$0xff] }
  0x48   :  { %513 = vmatpush.bf16.msra.mxu3 %v1089_v25 }
  0x49   :  { %427 = vmatpush.bf16.msra.mxu2 %v1080_v26 }
  0x4a   :  { %270 = vmatpush.bf16.msra.mxu0 %v1062_v12  ;;  %v1114_v12 = vld [vmem:[#allocation16 + $0x20] sm:$0xff] }
  0x4b   :  { %350 = vmatpush.bf16.msra.mxu1 %v1070_v15 }
  0x4c   :  { %514 = vmatpush.bf16.msra.mxu3 %v1088_v27 }
  0x4d   :  { %428 = vmatpush.bf16.msra.mxu2 %v1079_v28 }
  0x4e   :  { %271 = vmatpush.bf16.msra.mxu0 %v1061_v13  ;;  %v1133_v13 = vld [vmem:[%s1619_s12] ss:$0 sm:$0xff]  ;;  %s1427_s12 = smov [#allocation17]  }
  0x4f   :  { %351 = vmatpush.bf16.msra.mxu1 %v1069_v16  ;;  %s796_s6 = sshll.u32 %s1427_s12, 4  ;;  %s797_s6 = int_to_ptr.vmem [resolvable:$true] %s796_s6 }
  0x50   :  { %515 = vmatpush.bf16.msra.mxu3 %v1087_v30 }
  0x51   :  { %272 = vmatmul.bf16.vlgmr.msra.gmra.mxu0 %v198_v14  ;;  %429 = vmatpush.bf16.msra.mxu2 %v1078_v31  ;;  %v1135_v31 = vld [vmem:[%s1623_s16] ss:$0 sm:$0xff]  ;;  %s811_s16 = sshll.u32 %s1625_s18, 4  ;;  %s812_s16 = int_to_ptr.hbm [resolvable:$true] %s811_s16 }
  0x52   :  { %594 = vmatpush.bf16.msrb.mxu0 %v1101_v40 }
  0x53   :  { %679 = vmatpush.bf16.msrb.mxu1 %v1109_v53 }
  0x54   :  { %516 = vmatpush.bf16.msra.mxu3 %v1086_v34 }
  0x55   :  { %430 = vmatpush.bf16.msra.mxu2 %v1077_v39 }
  0x56   :  { %595 = vmatpush.bf16.msrb.mxu0 %v1100_v41 }
  0x57   :  { %517 = vmatmul.bf16.vlgmr.msra.gmra.mxu3 %v1085_v37  ;;  %680 = vmatpush.bf16.msrb.mxu1 %v1108_v54 }
  0x59   :  { %764 = vmatpush.bf16.msrb.mxu2 %v1117_v9 }
  0x5a   :  { %596 = vmatpush.bf16.msrb.mxu0 %v1099_v42 }
  0x5b   :  { %681 = vmatpush.bf16.msrb.mxu1 %v1107_v55 }
  0x5d   :  { %765 = vmatpush.bf16.msrb.mxu2 %v1116_v10 }
  0x5e   :  { %597 = vmatpush.bf16.msrb.mxu0 %v1098_v43 }
  0x5f   :  { %682 = vmatpush.bf16.msrb.mxu1 %v1106_v56 }
  0x61   :  { %766 = vmatpush.bf16.msrb.mxu2 %v1115_v11 }
  0x62   :  { %598 = vmatpush.bf16.msrb.mxu0 %v1097_v44 }
  0x63   :  { %683 = vmatpush.bf16.msrb.mxu1 %v1105_v57 }
  0x65   :  { %767 = vmatpush.bf16.msrb.mxu2 %v1114_v12 }
  0x66   :  { %599 = vmatpush.bf16.msrb.mxu0 %v1096_v50 }
  0x67   :  { %684 = vmatpush.bf16.msrb.mxu1 %v1104_v6 }
  0x69   :  { %768 = vmatpush.bf16.msrb.mxu2 %v1113_v19 }
  0x6a   :  { %600 = vmatpush.bf16.msrb.mxu0 %v1095_v51 }
  0x6b   :  { %685 = vmatpush.bf16.msrb.mxu1 %v1103_v7 }
  0x6d   :  { %769 = vmatpush.bf16.msrb.mxu2 %v1112_v20 }
  0x6e   :  { %601 = vmatpush.bf16.msrb.mxu0 %v1094_v52 }
  0x6f   :  { %686 = vmatpush.bf16.msrb.mxu1 %v1102_v8 }
  0x71   :  { %770 = vmatpush.bf16.msrb.mxu2 %v1111_v21 }
  0x75   :  { %771 = vmatpush.bf16.msrb.mxu2 %v1110_v22 }
  0xce   :  { %v273_v32 = vpop.f32.mrf.mxu0 }
  0xcf   :  { %v274_v33 = vadd.f32 %v273_v32, %v215_v29  ;;  %v1136_v32 = vld [vmem:[%s1610_s3] ss:$0 sm:$0xff] }
  0xd1   :  { %v277_v35 = vmax.f32 %v274_v33, 0.0 }
  0xd3   :  { %v278_v36 = vpack.c.bf16 %v277_v35, %v277_v35  ;;  %v1137_v35 = vld [vmem:[%s1631_s13] ss:$0 sm:$0xff] }
  0xd5   :  { %352 = vmatmul.bf16.vlgmr.msra.gmra.mxu1 %v278_v36 }
  0xd6   :  { %v275_v38 = vpop.f32.mrf.mxu0 }
  0xda   :  { %v518_v58 = vpop.f32.mrf.mxu3 }
  0xe2   :  { %v520_v63 = vpop.f32.mrf.mxu3 }
 0x152   :  { %v353_v46 = vpop.f32.mrf.mxu1 }
 0x153   :  { %v354_v47 = vadd.f32 %v353_v46, %v295_v45 }
 0x155   :  { %v357_v48 = vpack.c.bf16 %v354_v47, %v354_v47 }
 0x157   :  { %431 = vmatmul.bf16.vlgmr.msra.gmra.mxu2 %v357_v48 }
 0x15a   :  { %v355_v49 = vpop.f32.mrf.mxu1 }
 0x1da   :  { %v432_v60 = vpop.f32.mrf.mxu2 }
 0x1db   :  { %v433_v61 = vadd.f32 %v432_v60, %v374_v59 }
 0x1dd   :  { %v454_v62 = vperm.slane %v433_v61, 0 }
 0x1df   :  { %v519_v0 = vadd.f32 %v518_v58, %v454_v62  ;;  %v521_v1 = vadd.f32 %v520_v63, %v454_v62 }
 0x1e1   :  { %v523_v2 = vmax.f32 %v519_v0, 0.0  ;;  %v524_v3 = vmax.f32 %v521_v1, 0.0 }
 0x1e2   :  { %v434_v4 = vpop.f32.mrf.mxu2 }
 0x1e3   :  { %v525_v5 = vpack.c.bf16 %v524_v3, %v523_v2 }
 0x1e5   :  { %602 = vmatmul.bf16.vlgmr.msrb.gmra.mxu0 %v525_v5 }
 0x262   :  { %v603_v14 = vpop.f32.mrf.mxu0 }
 0x263   :  { %v604_v15 = vadd.f32 %v1133_v13, %v603_v14 }
 0x265   :  { %608 = vst [vmem:[#allocation17] sm:$0xff] %v604_v15 }
 0x26a   :  { %v605_v16 = vpop.f32.mrf.mxu0 }
 0x26b   :  { %v606_v17 = vadd.f32 %v1133_v13, %v605_v16 }
 0x26d   :  { %609 = vst [vmem:[#allocation17 + $0x8] sm:$0xff] %v606_v17  ;;  %v610_v18 = vpack.c.bf16 %v606_v17, %v604_v15 }
 0x26e   :  { %804 = dma.vmem_to_hbm [thread:$0]  %s797_s6, 256, %s799_s4, [#allocation4], %s1428_s30, %s1428_s30, %s1429_s19  }
 0x26f   :  { %687 = vmatmul.bf16.vlgmr.msrb.gmra.mxu1 %v610_v18 }
 0x2ec   :  { %v688_v23 = vpop.f32.mrf.mxu1 }
 0x2ed   :  { %v689_v25 = vadd.f32 %v1134_v24, %v688_v23 }
 0x2ef   :  { %v693_v28 = vmax.f32 %v689_v25, 0.0 }
 0x2f4   :  { %v690_v26 = vpop.f32.mrf.mxu1 }
 0x2f5   :  { %v691_v27 = vadd.f32 %v1134_v24, %v690_v26 }
 0x2f7   :  { %v694_v29 = vmax.f32 %v691_v27, 0.0 }
 0x2f9   :  { %v695_v30 = vpack.c.bf16 %v694_v29, %v693_v28 }
 0x2fb   :  { %772 = vmatmul.bf16.vlgmr.msrb.gmra.mxu2 %v695_v30 }
 0x37e   :  { %v773_v33 = vpop.f32.mrf.mxu2 }
 0x37f   :  { %v774_v34 = vadd.f32 %v1135_v31, %v773_v33 }
 0x381   :  { %v782_v36 = vmul.f32 %v1136_v32, %v774_v34 }
 0x383   :  { %v788_v37 = vadd.f32 %v1137_v35, %v782_v36 }
 0x385   :  { %790 = vst [vmem:[#allocation18] sm:$0xff] %v788_v37 }
 0x386   :  { %v775_v38 = vpop.f32.mrf.mxu2 }
 0x387   :  { %v776_v39 = vadd.f32 %v1135_v31, %v775_v38 }
 0x389   :  { %v783_v40 = vmul.f32 %v1136_v32, %v776_v39 }
 0x38b   :  { %v789_v41 = vadd.f32 %v1137_v35, %v783_v40 }
 0x38d   :  { %791 = vst [vmem:[#allocation18 + $0x8] sm:$0xff] %v789_v41 }
 0x38e   :  { %817 = dma.vmem_to_hbm [thread:$0]  %s810_s21, 256, %s812_s16, [#allocation19], %s1428_s30, %s1428_s30, %s1429_s19  }
 0x38f   :  { %1412 = dma.done.wait [#allocation4], 256  }
 0x390   :  { %1413 = vsyncadd [#allocation4], 4294967040 }
 0x391   :  { %1414 = dma.done.wait [#allocation19], 256  }
 0x392   :  { %1415 = vsyncadd [#allocation19], 4294967040 }
 0x393   :  { %826 = vsyncpa [#allocation3], 1 }
 0x394   :  { %827 = vsyncpa [#allocation6], 1 }
 0x395   :  { %828 = vsyncpa [#allocation9], 1 }
 0x396   :  { %829 = vsyncpa [#allocation12], 1 }
 0x397   :  { %830 = vsyncpa [#allocation15], 1 }
 0x398   :  { %831 = vsyncpa [#allocation4], 1 }
 0x399   :  { %832 = vsyncpa [#allocation19], 1 }

</bundles_post_ra>
